<compile_context>
chip_gen: v7x
topology: tpu7x:2x2x1
jax: 0.10.0
libtpu: 0.0.40
codegen_flags: <defaults>
</compile_context>

<pallas_src>
import functools
import math

import jax
import jax.numpy as jnp
from jax.experimental import pallas as pl
from jax.experimental.pallas import tpu as pltpu


def _round_up(v, m):
    return (v + m - 1) // m * m


def _pad2d(arr, rows, cols, dtype):
    """Pad a 2-D array with zeros to (rows, cols) and cast — in one fused pass."""
    r, c = arr.shape
    if (r, c) == (rows, cols):
        return arr if arr.dtype == dtype else arr.astype(dtype)
    buf = jnp.zeros((rows, cols), dtype)
    return buf.at[:r, :c].set(arr.astype(dtype))


# --------------------------------------------------------------------------- #
# Kernels
# --------------------------------------------------------------------------- #
def _resident_kernel(x_ref, w_ref, gamma_ref, beta_ref, o_ref, *, inv_n, eps, tn):
    # x_ref     : (Np, Dp)  bf16, VMEM-resident (fetched once, single-buffered)
    # w_ref     : (Dp, TN)  bf16 column tile of the gating weights
    # gamma_ref : (1, Dp)   f32, resident
    # beta_ref  : (1, Dp)   f32, resident
    # o_ref     : (Np, TN)  output column tile
    j = pl.program_id(0)
    col = pl.multiple_of(j * tn, 128)

    # MXU: one column tile of the gates, f32 accumulation.
    gates = jnp.dot(x_ref[...], w_ref[...], preferred_element_type=jnp.float32)

    # Training-mode BatchNorm1d batch statistics, fused single pass.
    # Zero-padded rows contribute 0 to both sums; divide by the true N via inv_n.
    s = jnp.sum(gates, axis=0, keepdims=True)
    s2 = jnp.sum(gates * gates, axis=0, keepdims=True)
    mean = s * inv_n
    var = jnp.maximum(s2 * inv_n - mean * mean, 0.0)      # clamp: cancellation guard

    # Folded affine:  (g - mean) * inv_std * gamma + beta  ==  g * a + b
    a = jax.lax.rsqrt(var + eps) * gamma_ref[:, pl.ds(col, tn)]
    b = beta_ref[:, pl.ds(col, tn)] - mean * a
    gate = jax.nn.sigmoid(gates * a + b)

    # Elementwise gate re-uses the resident x — no second HBM stream of x.
    x_col = x_ref[:, pl.ds(col, tn)].astype(jnp.float32)
    o_ref[...] = (x_col * gate).astype(o_ref.dtype)


def _stream_kernel(xk_ref, xcol_ref, w_ref, gamma_ref, beta_ref, o_ref, acc_ref,
                   *, inv_n, eps):
    # xk_ref    : (Np, TK)  bf16 K-slice of x (matmul operand, streamed over k)
    # xcol_ref  : (Np, TN)  bf16 feature-column tile of x (fetched once per j)
    # w_ref     : (TK, TN)  bf16 W tile
    # gamma/beta: (1, TN)   f32 BN affine tiles
    # o_ref     : (Np, TN)  output column tile
    # acc_ref   : (Np, TN)  f32 accumulator scratch
    k = pl.program_id(1)

    @pl.when(k == 0)
    def _():
        acc_ref[...] = jnp.zeros_like(acc_ref)

    acc_ref[...] += jnp.dot(xk_ref[...], w_ref[...],
                            preferred_element_type=jnp.float32)

    @pl.when(k == pl.num_programs(1) - 1)
    def _():
        gates = acc_ref[...]
        s = jnp.sum(gates, axis=0, keepdims=True)
        s2 = jnp.sum(gates * gates, axis=0, keepdims=True)
        mean = s * inv_n
        var = jnp.maximum(s2 * inv_n - mean * mean, 0.0)
        a = jax.lax.rsqrt(var + eps) * gamma_ref[...]
        b = beta_ref[...] - mean * a
        gate = jax.nn.sigmoid(gates * a + b)
        o_ref[...] = (xcol_ref[...].astype(jnp.float32) * gate).astype(o_ref.dtype)


# --------------------------------------------------------------------------- #
# Wrapper
# --------------------------------------------------------------------------- #
def gating_context(x, gating_weights, gamma, beta, *, eps=1e-5, force_stream=False):
    """GatingContext forward (BatchNorm path).

    x: (N, dim); gating_weights: (dim, dim); gamma/beta: (dim,) or (1, dim).
    """
    n, dim = x.shape
    out_dtype = x.dtype
    out_itemsize = jnp.dtype(out_dtype).itemsize

    np_ = _round_up(n, 16)                 # bf16 packs 16 rows per sublane group

    try:
        vmem_cap = int(pltpu.get_tpu_info().vmem_capacity_bytes)
    except Exception:                      # conservative default (v7x per-core)
        vmem_cap = 64 * 1024 * 1024
    vmem_budget = int(vmem_cap * 0.85)

    # Lane-dense feature tiles, preferring wide tiles; small dims get a single
    # full-width tile instead of degrading to 128.
    dim128 = _round_up(dim, 128)
    tn_candidates = (dim128,) if dim128 <= 512 else (512, 256, 128)

    def resident_bytes(tn, dp):
        return (np_ * dp * 2                     # resident bf16 x (single buffer)
                + 2 * dp * tn * 2                # double-buffered bf16 W column tiles
                + 2 * dp * 4                     # resident gamma + beta (f32)
                + 2 * np_ * tn * out_itemsize    # double-buffered out tiles
                + 2 * np_ * tn * 4)              # f32 gates tile + temporary

    def stream_bytes(tn, tk):
        return (2 * np_ * tk * 2                 # double-buffered x K-slices
                + 2 * np_ * tn * 2               # double-buffered x column tiles
                + 2 * tk * tn * 2                # double-buffered W tiles
                + 4 * tn * 4                     # gamma / beta tiles
                + np_ * tn * 4                   # f32 accumulator scratch
                + 2 * np_ * tn * out_itemsize    # double-buffered out tiles
                + 2 * np_ * tn * 4)              # f32 epilogue temporaries

    plan = None
    if not force_stream:
        for tn in tn_candidates:
            dp = _round_up(dim, tn)
            est = resident_bytes(tn, dp)
            if est <= vmem_budget:
                plan = ("resident", tn, tn, dp, est)
                break
    if plan is None:
        for tn in tn_candidates:
            dp = _round_up(dim, tn)
            est = stream_bytes(tn, tn)
            if est <= vmem_budget:
                plan = ("stream", tn, tn, dp, est)
                break
    if plan is None:
        # TODO(synk): very large N additionally needs row tiling with a cross-tile
        # BatchNorm reduction; take the smallest streaming tiles and let the
        # compiler arbitrate.
        tn = 128
        dp = _round_up(dim, tn)
        plan = ("stream", tn, tn, dp, stream_bytes(tn, tn))

    mode, tn, tk, dp, est = plan
    vmem_limit = min(max(int(est * 1.5), 32 * 1024 * 1024), vmem_budget)

    # Single bf16 copy of x (pad + cast fused); bf16 W; f32 BN affine params.
    x_b = _pad2d(x, np_, dp, jnp.bfloat16)
    w_b = _pad2d(gating_weights, dp, dp, jnp.bfloat16)
    gamma_p = _pad2d(jnp.reshape(gamma, (1, dim)), 1, dp, jnp.float32)
    beta_p = _pad2d(jnp.reshape(beta, (1, dim)), 1, dp, jnp.float32)

    cost = pl.CostEstimate(
        flops=2 * np_ * dp * dp + 8 * np_ * dp,
        transcendentals=np_ * dp + dp,                       # sigmoid + rsqrt
        bytes_accessed=np_ * dp * 2 + dp * dp * 2 + np_ * dp * out_itemsize,
    )

    inv_n = 1.0 / n

    if mode == "resident":
        def call(single_buffer_resident):
            def const_spec(shape):
                if single_buffer_resident:
                    return pl.BlockSpec(shape, lambda j: (0, 0),
                                        pipeline_mode=pl.Buffered(1))
                return pl.BlockSpec(shape, lambda j: (0, 0))
            return pl.pallas_call(
                functools.partial(_resident_kernel, inv_n=inv_n, eps=eps, tn=tn),
                out_shape=jax.ShapeDtypeStruct((np_, dp), out_dtype),
                grid=(dp // tn,),
                in_specs=[
                    const_spec((np_, dp)),                      # resident bf16 x
                    pl.BlockSpec((dp, tn), lambda j: (0, j)),   # W column tile
                    const_spec((1, dp)),                        # gamma (resident)
                    const_spec((1, dp)),                        # beta (resident)
                ],
                out_specs=pl.BlockSpec((np_, tn), lambda j: (0, j)),
                compiler_params=pltpu.CompilerParams(
                    dimension_semantics=("parallel",),
                    vmem_limit_bytes=vmem_limit,
                ),
                cost_estimate=cost,
            )(x_b, w_b, gamma_p, beta_p)

        try:
            out_p = call(True)
        except Exception:
            # Fallback for jax builds without single-buffer pipeline_mode support:
            # accept default double-buffered resident operands rather than failing.
            out_p = call(False)
    else:
        out_p = pl.pallas_call(
            functools.partial(_stream_kernel, inv_n=inv_n, eps=eps),
            out_shape=jax.ShapeDtypeStruct((np_, dp), out_dtype),
            grid=(dp // tn, dp // tk),
            in_specs=[
                pl.BlockSpec((np_, tk), lambda j, k: (0, k)),   # x K-slice
                pl.BlockSpec((np_, tn), lambda j, k: (0, j)),   # x column tile
                pl.BlockSpec((tk, tn), lambda j, k: (k, j)),    # W tile
                pl.BlockSpec((1, tn), lambda j, k: (0, j)),     # gamma
                pl.BlockSpec((1, tn), lambda j, k: (0, j)),     # beta
            ],
            out_specs=pl.BlockSpec((np_, tn), lambda j, k: (0, j)),
            scratch_shapes=[pltpu.VMEM((np_, tn), jnp.float32)],
            compiler_params=pltpu.CompilerParams(
                dimension_semantics=("parallel", "arbitrary"),
                vmem_limit_bytes=vmem_limit,
            ),
            cost_estimate=cost,
        )(x_b, x_b, w_b, gamma_p, beta_p)

    return out_p[:n, :dim]


# --------------------------------------------------------------------------- #
# References
# --------------------------------------------------------------------------- #
def reference_matched(x, w, gamma, beta, eps=1e-5):
    """Reference mirroring the kernel's bf16 operand feed + f32 epilogue."""
    xb = x.astype(jnp.bfloat16)
    gates = jnp.dot(xb, w.astype(jnp.bfloat16), preferred_element_type=jnp.float32)
    mean = jnp.mean(gates, axis=0, keepdims=True)
    var = jnp.mean((gates - mean) ** 2, axis=0, keepdims=True)
    gates = (gates - mean) * jax.lax.rsqrt(var + eps) * gamma + beta
    gates = jax.nn.sigmoid(gates)
    return (xb.astype(jnp.float32) * gates).astype(x.dtype)


def reference_f32(x, w, gamma, beta, eps=1e-5):
    """Pure f32 reference of the PyTorch module (training-mode BatchNorm1d)."""
    gates = x @ w
    mean = gates.mean(axis=0, keepdims=True)
    var = ((gates - mean) ** 2).mean(axis=0, keepdims=True)
    gates = (gates - mean) / jnp.sqrt(var + eps) * gamma + beta
    gates = jax.nn.sigmoid(gates)
    return x * gates


# --------------------------------------------------------------------------- #
# Self-test
# --------------------------------------------------------------------------- #
if __name__ == "__main__":
    root = jax.random.PRNGKey(0)

    def run_case(n, dim, force_stream=False, tag=""):
        kx, kw, kg, kb = jax.random.split(jax.random.fold_in(root, 131 * n + dim), 4)
        x = jax.random.normal(kx, (n, dim), dtype=jnp.float32)
        # torch.randn(dim, dim) / sqrt(dim) init; non-trivial BN affine params.
        w = jax.random.normal(kw, (dim, dim), dtype=jnp.float32) * (1.0 / math.sqrt(dim))
        gamma = 1.0 + 0.1 * jax.random.normal(kg, (1, dim), dtype=jnp.float32)
        beta = 0.1 * jax.random.normal(kb, (1, dim), dtype=jnp.float32)

        out = jax.block_until_ready(
            gating_context(x, w, gamma, beta, force_stream=force_stream))
        assert out.shape == (n, dim) and out.dtype == x.dtype, tag

        # Tight check vs a reference using the same bf16 operand feed.
        ref_m = reference_matched(x, w, gamma, beta)
        assert jnp.allclose(out, ref_m, atol=2e-3, rtol=2e-3), f"matched-ref mismatch: {tag}"

        # Loose sanity check vs pure-f32 module semantics (bf16 feed tolerance).
        ref_f = reference_f32(x, w, gamma, beta)
        assert jnp.allclose(out, ref_f, atol=5e-2, rtol=5e-2), f"f32-ref mismatch: {tag}"

    run_case(8, 32, tag="single-tile resident path")
    run_case(40, 640, tag="multi-tile resident path + row/col padding")
    run_case(40, 640, force_stream=True, tag="K-tiled streaming path")
    print("KERNEL_OK")
</pallas_src>

<mosaic_0001>
module attributes {stable_mosaic.version = 11 : i64} {
  func.func @_resident_kernel(%arg0: i32, %arg1: memref<16x128xbf16, #tpu.memory_space<vmem>>, %arg2: memref<128x128xbf16, #tpu.memory_space<vmem>>, %arg3: memref<1x128xf32, #tpu.memory_space<vmem>>, %arg4: memref<1x128xf32, #tpu.memory_space<vmem>>, %arg5: memref<16x128xf32, #tpu.memory_space<vmem>>) attributes {dimension_semantics = [#tpu.dimension_semantics<parallel>], iteration_bounds = array<i64: 1>, scalar_prefetch = 0 : i64, scratch_operands = 0 : i64, tpu.core_type = #tpu.core_type<tc>, window_params = [{pipeline_mode = #tpu.pipeline_mode<synchronous>, transform_indices = @transform_0, window_bounds = array<i64: 16, 128>}, {transform_indices = @transform_1, window_bounds = array<i64: 128, 128>}, {pipeline_mode = #tpu.pipeline_mode<synchronous>, transform_indices = @transform_2, window_bounds = array<i64: 1, 128>}, {pipeline_mode = #tpu.pipeline_mode<synchronous>, transform_indices = @transform_3, window_bounds = array<i64: 1, 128>}, {transform_indices = @transform_4, window_bounds = array<i64: 16, 128>}]} {
    %c128_i32 = arith.constant 128 : i32
    %0 = arith.muli %arg0, %c128_i32 : i32
    %1 = tpu.assume_multiple %0, 128 : i32
    %c0 = arith.constant 0 : index
    %c0_0 = arith.constant 0 : index
    %2 = vector.load %arg1[%c0, %c0_0] : memref<16x128xbf16, #tpu.memory_space<vmem>>, vector<16x128xbf16>
    %c0_1 = arith.constant 0 : index
    %c0_2 = arith.constant 0 : index
    %3 = vector.load %arg2[%c0_1, %c0_2] : memref<128x128xbf16, #tpu.memory_space<vmem>>, vector<128x128xbf16>
    %cst = arith.constant dense<0.000000e+00> : vector<16x128xf32>
    %4 = tpu.matmul %2, %3, %cst {dimension_numbers = #tpu.dot_dimension_numbers<[1], [0], [0], [1], [0, 0, 1, 1], [], []>} : vector<16x128xbf16>, vector<128x128xbf16>, vector<16x128xf32> -> vector<16x128xf32>
    %cst_3 = arith.constant dense<0.000000e+00> : vector<128xf32>
    %5 = vector.multi_reduction <add>, %4, %cst_3 [0] : vector<16x128xf32> to vector<128xf32>
    %6 = vector.shape_cast %5 : vector<128xf32> to vector<1x128xf32>
    %7 = arith.mulf %4, %4 : vector<16x128xf32>
    %cst_4 = arith.constant dense<0.000000e+00> : vector<128xf32>
    %8 = vector.multi_reduction <add>, %7, %cst_4 [0] : vector<16x128xf32> to vector<128xf32>
    %9 = vector.shape_cast %8 : vector<128xf32> to vector<1x128xf32>
    %cst_5 = arith.constant 1.250000e-01 : f32
    %10 = vector.broadcast %cst_5 : f32 to vector<1x128xf32>
    %11 = arith.mulf %6, %10 : vector<1x128xf32>
    %cst_6 = arith.constant 1.250000e-01 : f32
    %12 = vector.broadcast %cst_6 : f32 to vector<1x128xf32>
    %13 = arith.mulf %9, %12 : vector<1x128xf32>
    %14 = arith.mulf %11, %11 : vector<1x128xf32>
    %15 = arith.subf %13, %14 : vector<1x128xf32>
    %cst_7 = arith.constant 0.000000e+00 : f32
    %16 = vector.broadcast %cst_7 : f32 to vector<1x128xf32>
    %17 = arith.maximumf %15, %16 : vector<1x128xf32>
    %cst_8 = arith.constant 9.99999974E-6 : f32
    %18 = vector.broadcast %cst_8 : f32 to vector<1x128xf32>
    %19 = arith.addf %17, %18 : vector<1x128xf32>
    %20 = math.rsqrt %19 : vector<1x128xf32>
    %c0_9 = arith.constant 0 : index
    %21 = arith.index_cast %1 : i32 to index
    %22 = vector.load %arg3[%c0_9, %21] : memref<1x128xf32, #tpu.memory_space<vmem>>, vector<1x128xf32>
    %23 = arith.mulf %20, %22 : vector<1x128xf32>
    %c0_10 = arith.constant 0 : index
    %24 = arith.index_cast %1 : i32 to index
    %25 = vector.load %arg4[%c0_10, %24] : memref<1x128xf32, #tpu.memory_space<vmem>>, vector<1x128xf32>
    %26 = arith.mulf %11, %23 : vector<1x128xf32>
    %27 = arith.subf %25, %26 : vector<1x128xf32>
    %28 = vector.broadcast %23 : vector<1x128xf32> to vector<16x128xf32>
    %29 = arith.mulf %4, %28 : vector<16x128xf32>
    %30 = vector.broadcast %27 : vector<1x128xf32> to vector<16x128xf32>
    %31 = arith.addf %29, %30 : vector<16x128xf32>
    %32 = arith.negf %31 : vector<16x128xf32>
    %33 = math.exp %32 : vector<16x128xf32>
    %cst_11 = arith.constant 1.000000e+00 : f32
    %34 = vector.broadcast %cst_11 : f32 to vector<16x128xf32>
    %35 = arith.addf %34, %33 : vector<16x128xf32>
    %36 = arith.divf %34, %35 : vector<16x128xf32>
    %c0_12 = arith.constant 0 : index
    %37 = arith.index_cast %1 : i32 to index
    %38 = vector.load %arg1[%c0_12, %37] : memref<16x128xbf16, #tpu.memory_space<vmem>>, vector<16x128xbf16>
    %39 = arith.extf %38 : vector<16x128xbf16> to vector<16x128xf32>
    %40 = arith.mulf %39, %36 : vector<16x128xf32>
    %c0_13 = arith.constant 0 : index
    %c0_14 = arith.constant 0 : index
    %41 = vector.load %arg5[%c0_13, %c0_14] : memref<16x128xf32, #tpu.memory_space<vmem>>, vector<16x128xf32>
    tpu.vector_store %arg5[%c0_13, %c0_14], %40 {strides = array<i32>} : memref<16x128xf32, #tpu.memory_space<vmem>>, vector<16x128xf32>,
    return
  }
  func.func @transform_0(%arg0: i32) -> (i32, i32) {
    %c0_i32 = arith.constant 0 : i32
    %c0_i32_0 = arith.constant 0 : i32
    %c0_i32_1 = arith.constant 0 : i32
    return %c0_i32, %c0_i32_0 : i32, i32
  }
  func.func @transform_1(%arg0: i32) -> (i32, i32) {
    %c0_i32 = arith.constant 0 : i32
    %c0_i32_0 = arith.constant 0 : i32
    return %c0_i32, %arg0 : i32, i32
  }
  func.func @transform_2(%arg0: i32) -> (i32, i32) {
    %c0_i32 = arith.constant 0 : i32
    %c0_i32_0 = arith.constant 0 : i32
    %c0_i32_1 = arith.constant 0 : i32
    return %c0_i32, %c0_i32_0 : i32, i32
  }
  func.func @transform_3(%arg0: i32) -> (i32, i32) {
    %c0_i32 = arith.constant 0 : i32
    %c0_i32_0 = arith.constant 0 : i32
    %c0_i32_1 = arith.constant 0 : i32
    return %c0_i32, %c0_i32_0 : i32, i32
  }
  func.func @transform_4(%arg0: i32) -> (i32, i32) {
    %c0_i32 = arith.constant 0 : i32
    %c0_i32_0 = arith.constant 0 : i32
    return %c0_i32, %arg0 : i32, i32
  }
}

module attributes {stable_mosaic.version = 11 : i64} {
  func.func @_resident_kernel(%arg0: i32, %arg1: memref<16x128xbf16, #tpu.memory_space<vmem>>, %arg2: memref<128x128xbf16, #tpu.memory_space<vmem>>, %arg3: memref<1x128xf32, #tpu.memory_space<vmem>>, %arg4: memref<1x128xf32, #tpu.memory_space<vmem>>, %arg5: memref<16x128xf32, #tpu.memory_space<vmem>>) attributes {dimension_semantics = [#tpu.dimension_semantics<parallel>], iteration_bounds = array<i64: 1>, scalar_prefetch = 0 : i64, scratch_operands = 0 : i64, tpu.core_type = #tpu.core_type<tc>, window_params = [{pipeline_mode = #tpu.pipeline_mode<synchronous>, transform_indices = @transform_0, window_bounds = array<i64: 16, 128>}, {transform_indices = @transform_1, window_bounds = array<i64: 128, 128>}, {pipeline_mode = #tpu.pipeline_mode<synchronous>, transform_indices = @transform_2, window_bounds = array<i64: 1, 128>}, {pipeline_mode = #tpu.pipeline_mode<synchronous>, transform_indices = @transform_3, window_bounds = array<i64: 1, 128>}, {transform_indices = @transform_4, window_bounds = array<i64: 16, 128>}]} {
    %c128_i32 = arith.constant 128 : i32
    %0 = arith.muli %arg0, %c128_i32 : i32
    %1 = tpu.assume_multiple %0, 128 : i32
    %c0 = arith.constant 0 : index
    %c0_0 = arith.constant 0 : index
    %2 = vector.load %arg1[%c0, %c0_0] : memref<16x128xbf16, #tpu.memory_space<vmem>>, vector<16x128xbf16>
    %c0_1 = arith.constant 0 : index
    %c0_2 = arith.constant 0 : index
    %3 = vector.load %arg2[%c0_1, %c0_2] : memref<128x128xbf16, #tpu.memory_space<vmem>>, vector<128x128xbf16>
    %cst = arith.constant dense<0.000000e+00> : vector<16x128xf32>
    %4 = tpu.matmul %2, %3, %cst {dimension_numbers = #tpu.dot_dimension_numbers<[1], [0], [0], [1], [0, 0, 1, 1], [], []>} : vector<16x128xbf16>, vector<128x128xbf16>, vector<16x128xf32> -> vector<16x128xf32>
    %cst_3 = arith.constant dense<0.000000e+00> : vector<128xf32>
    %5 = vector.multi_reduction <add>, %4, %cst_3 [0] : vector<16x128xf32> to vector<128xf32>
    %6 = vector.shape_cast %5 : vector<128xf32> to vector<1x128xf32>
    %7 = arith.mulf %4, %4 : vector<16x128xf32>
    %cst_4 = arith.constant dense<0.000000e+00> : vector<128xf32>
    %8 = vector.multi_reduction <add>, %7, %cst_4 [0] : vector<16x128xf32> to vector<128xf32>
    %9 = vector.shape_cast %8 : vector<128xf32> to vector<1x128xf32>
    %cst_5 = arith.constant 1.250000e-01 : f32
    %10 = vector.broadcast %cst_5 : f32 to vector<1x128xf32>
    %11 = arith.mulf %6, %10 : vector<1x128xf32>
    %cst_6 = arith.constant 1.250000e-01 : f32
    %12 = vector.broadcast %cst_6 : f32 to vector<1x128xf32>
    %13 = arith.mulf %9, %12 : vector<1x128xf32>
    %14 = arith.mulf %11, %11 : vector<1x128xf32>
    %15 = arith.subf %13, %14 : vector<1x128xf32>
    %cst_7 = arith.constant 0.000000e+00 : f32
    %16 = vector.broadcast %cst_7 : f32 to vector<1x128xf32>
    %17 = arith.maximumf %15, %16 : vector<1x128xf32>
    %cst_8 = arith.constant 9.99999974E-6 : f32
    %18 = vector.broadcast %cst_8 : f32 to vector<1x128xf32>
    %19 = arith.addf %17, %18 : vector<1x128xf32>
    %20 = math.rsqrt %19 : vector<1x128xf32>
    %c0_9 = arith.constant 0 : index
    %21 = arith.index_cast %1 : i32 to index
    %22 = vector.load %arg3[%c0_9, %21] : memref<1x128xf32, #tpu.memory_space<vmem>>, vector<1x128xf32>
    %23 = arith.mulf %20, %22 : vector<1x128xf32>
    %c0_10 = arith.constant 0 : index
    %24 = arith.index_cast %1 : i32 to index
    %25 = vector.load %arg4[%c0_10, %24] : memref<1x128xf32, #tpu.memory_space<vmem>>, vector<1x128xf32>
    %26 = arith.mulf %11, %23 : vector<1x128xf32>
    %27 = arith.subf %25, %26 : vector<1x128xf32>
    %28 = vector.broadcast %23 : vector<1x128xf32> to vector<16x128xf32>
    %29 = arith.mulf %4, %28 : vector<16x128xf32>
    %30 = vector.broadcast %27 : vector<1x128xf32> to vector<16x128xf32>
    %31 = arith.addf %29, %30 : vector<16x128xf32>
    %32 = arith.negf %31 : vector<16x128xf32>
    %33 = math.exp %32 : vector<16x128xf32>
    %cst_11 = arith.constant 1.000000e+00 : f32
    %34 = vector.broadcast %cst_11 : f32 to vector<16x128xf32>
    %35 = arith.addf %34, %33 : vector<16x128xf32>
    %36 = arith.divf %34, %35 : vector<16x128xf32>
    %c0_12 = arith.constant 0 : index
    %37 = arith.index_cast %1 : i32 to index
    %38 = vector.load %arg1[%c0_12, %37] : memref<16x128xbf16, #tpu.memory_space<vmem>>, vector<16x128xbf16>
    %39 = arith.extf %38 : vector<16x128xbf16> to vector<16x128xf32>
    %40 = arith.mulf %39, %36 : vector<16x128xf32>
    %c0_13 = arith.constant 0 : index
    %c0_14 = arith.constant 0 : index
    %41 = vector.load %arg5[%c0_13, %c0_14] : memref<16x128xf32, #tpu.memory_space<vmem>>, vector<16x128xf32>
    tpu.vector_store %arg5[%c0_13, %c0_14], %40 {strides = array<i32>} : memref<16x128xf32, #tpu.memory_space<vmem>>, vector<16x128xf32>,
    return
  }
  func.func @transform_0(%arg0: i32) -> (i32, i32) {
    %c0_i32 = arith.constant 0 : i32
    %c0_i32_0 = arith.constant 0 : i32
    %c0_i32_1 = arith.constant 0 : i32
    return %c0_i32, %c0_i32_0 : i32, i32
  }
  func.func @transform_1(%arg0: i32) -> (i32, i32) {
    %c0_i32 = arith.constant 0 : i32
    %c0_i32_0 = arith.constant 0 : i32
    return %c0_i32, %arg0 : i32, i32
  }
  func.func @transform_2(%arg0: i32) -> (i32, i32) {
    %c0_i32 = arith.constant 0 : i32
    %c0_i32_0 = arith.constant 0 : i32
    %c0_i32_1 = arith.constant 0 : i32
    return %c0_i32, %c0_i32_0 : i32, i32
  }
  func.func @transform_3(%arg0: i32) -> (i32, i32) {
    %c0_i32 = arith.constant 0 : i32
    %c0_i32_0 = arith.constant 0 : i32
    %c0_i32_1 = arith.constant 0 : i32
    return %c0_i32, %c0_i32_0 : i32, i32
  }
  func.func @transform_4(%arg0: i32) -> (i32, i32) {
    %c0_i32 = arith.constant 0 : i32
    %c0_i32_0 = arith.constant 0 : i32
    return %c0_i32, %arg0 : i32, i32
  }
}

</mosaic_0001>

<bundles_post_ra>
// kernel: tpu_custom_call.1
= control target key start
LH: loop header
LB: loop body
LE: loop exit
PB: predicated region body
PF: predicated region fallthrough
CT: control target
= control target key end

     0   :  { %9 = vsyncpa [#allocation3], 0  ;;  %s471_s0 = inlined_call_operand.hbm [shape: bf16[16,128], index: 0, kind: input, shape index: {}]   ;;  %s472_s1 = inlined_call_operand.hbm [shape: bf16[128,128], index: 1, kind: input, shape index: {}]   ;;  %s473_s2 = inlined_call_operand.vmem [shape: f32[1,128], index: 2, kind: input, shape index: {}]   ;;  %s474_s3 = inlined_call_operand.vmem [shape: f32[1,128], index: 3, kind: input, shape index: {}]   ;;  %s475_s4 = inlined_call_operand.hbm [shape: f32[16,128], index: 4, kind: output, shape index: {}]  }
   0x1   :  { %10 = vsyncpa [#allocation6], 0 }
   0x2   :  { %11 = vsyncpa [#allocation4], 0  ;;  %s395_s15 = smov [#allocation2]   ;;  %s323_s19 = scalar_lea.hbm %s471_s0, 128 }
   0x3   :  { %s17_s16 = sshll.u32 %s395_s15, 4  ;;  %p324_p0 = scmp.ne.s32.totalorder %s471_s0, %s323_s19  ;;  %s18_s16 = int_to_ptr.vmem [resolvable:$true] %s17_s16 }
   0x4   :  { %p327_p1 = scmp.lt.u32.totalorder %s323_s19, %s471_s0 }
   0x6   :  { %p329_p2 = pnand %p327_p1, %p324_p0 }
   0x8   :  { %332 = shalt.err (!%p329_p2)
}
   0x9   :  { %s333_s24 = scalar_lea.vmem %s18_s16, 128  ;;  %p338_p4 = scmp.lt.s32.totalorder %s18_s16, %s18_s16 }
   0xa   :  { %p334_p3 = scmp.ne.s32.totalorder %s18_s16, %s333_s24  ;;  %p339_p5 = scmp.lt.s32.totalorder %s333_s24, %s333_s24 }
   0xc   :  { %p340_p6 = por %p339_p5, %p338_p4 }
   0xe   :  { %p341_p7 = pnand %p340_p6, %p334_p3 }
  0x10   :  { %344 = shalt.err (!%p341_p7)
}
  0x11   :  { %s396_s25 = smov 64   ;;  %s397_s26 = smov 4  }
  0x12   :  { %23 = dma.hbm_to_vmem [thread:$0]  %s471_s0, 128, %s18_s16, [#allocation3], %s396_s25, %s396_s25, %s397_s26  }
  0x13   :  { %s398_s29 = smov [#allocation5]   ;;  %s345_s7 = scalar_lea.hbm %s472_s1, 1024 }
  0x14   :  { %s29_s30 = sshll.u32 %s398_s29, 4  ;;  %p346_p8 = scmp.ne.s32.totalorder %s472_s1, %s345_s7  ;;  %s30_s30 = int_to_ptr.vmem [resolvable:$true] %s29_s30 }
  0x15   :  { %p349_p9 = scmp.lt.u32.totalorder %s345_s7, %s472_s1 }
  0x17   :  { %p351_p10 = pnand %p349_p9, %p346_p8 }
  0x19   :  { %354 = shalt.err (!%p351_p10)
}
  0x1a   :  { %s355_s12 = scalar_lea.vmem %s30_s30, 1024  ;;  %p360_p12 = scmp.lt.s32.totalorder %s30_s30, %s30_s30 }
  0x1b   :  { %p356_p11 = scmp.ne.s32.totalorder %s30_s30, %s355_s12  ;;  %p361_p13 = scmp.lt.s32.totalorder %s355_s12, %s355_s12 }
  0x1d   :  { %p362_p0 = por %p361_p13, %p360_p12 }
  0x1f   :  { %p363_p1 = pnand %p362_p0, %p356_p11 }
  0x21   :  { %366 = shalt.err (!%p363_p1)
}
  0x22   :  { %35 = dma.hbm_to_vmem [thread:$0]  %s472_s1, 1024, %s30_s30, [#allocation6], %s396_s25, %s396_s25, %s397_s26  }
  0x23   :  { %389 = dma.done.wait [#allocation3], 128  }
  0x24   :  { %390 = vsyncadd [#allocation3], 4294967168 }
  0x25   :  { %391 = dma.done.wait [#allocation6], 1024  }
  0x26   :  { %392 = vsyncadd [#allocation6], 4294966272  ;;  %v399_v0 = vmov 0.0   ;;  %vm400_vm0 = vmmov 0   ;;  %v304_v1 = vld [vmem:[#allocation5] sm:$0xff]   ;;  %v305_v2 = vld [vmem:[#allocation5 + $0x8] sm:$0xff]   ;;  %v193_v36 = vlaneseq }
  0x27   :  { %275 = vmatprep.subr.bf16.mxu0 %v399_v0  ;;  %291 = vmatprep.mubr.msk.bf16.mxu0 %vm400_vm0, %v399_v0  ;;  %v306_v3 = vld [vmem:[#allocation5 + $0x10] sm:$0xff]   ;;  %v307_v4 = vld [vmem:[#allocation5 + $0x18] sm:$0xff]   ;;  %v308_v5 = vld [vmem:[#allocation5 + $0x20] sm:$0xff]  }
  0x28   :  { %276 = vmatpush3.bf16.msra.mxu0 %v304_v1  ;;  %v309_v6 = vld [vmem:[#allocation5 + $0x28] sm:$0xff]   ;;  %v310_v7 = vld [vmem:[#allocation5 + $0x30] sm:$0xff]   ;;  %v311_v8 = vld [vmem:[#allocation5 + $0x38] sm:$0xff]   ;;  %v194_v37 = vshrl.u32 %v193_v36, 7 }
  0x29   :  { %277 = vmatprep.subr.bf16.mxu0 %v399_v0  ;;  %v312_v9 = vld [vmem:[#allocation2] sm:$0xff]  }
  0x2a   :  { %v187_v38 = vld [vmem:[%s473_s2] sm:$0x1]  ;;  %v195_v39 = vsub.s32 0, %v194_v37  ;;  %s401_s2 = smov [#allocation7]  }
  0x2b   :  { %v190_v42 = vld [vmem:[%s474_s3] sm:$0x1]  ;;  %s234_s3 = sshll.u32 %s401_s2, 4  ;;  %s235_s3 = int_to_ptr.vmem [resolvable:$true] %s234_s3 }
  0x2c   :  { %278 = vmatpush3.bf16.msra.mxu0 %v305_v2  ;;  %v263_v57 = vld [vmem:[#allocation2] sm:$0xff]   ;;  %s367_s17 = scalar_lea.vmem %s235_s3, 256  ;;  %p372_p3 = scmp.lt.s32.totalorder %s235_s3, %s235_s3 }
  0x2d   :  { %279 = vmatprep.subr.bf16.mxu0 %v399_v0  ;;  %v264_v58 = vunpack.c.l.bf16 %v263_v57  ;;  %v265_v59 = vunpack.c.h.bf16 %v263_v57  ;;  %p368_p2 = scmp.ne.s32.totalorder %s235_s3, %s367_s17  ;;  %p373_p4 = scmp.lt.s32.totalorder %s367_s17, %s367_s17 }
  0x2f   :  { %p374_p5 = por %p373_p4, %p372_p3 }
  0x30   :  { %280 = vmatpush3.bf16.msra.mxu0 %v306_v3 }
  0x31   :  { %281 = vmatprep.subr.bf16.mxu0 %v399_v0  ;;  %p375_p6 = pnand %p374_p5, %p368_p2 }
  0x34   :  { %282 = vmatpush3.bf16.msra.mxu0 %v307_v4 }
  0x35   :  { %283 = vmatprep.subr.bf16.mxu0 %v399_v0 }
  0x38   :  { %284 = vmatpush3.bf16.msra.mxu0 %v308_v5 }
  0x39   :  { %285 = vmatprep.subr.bf16.mxu0 %v399_v0 }
  0x3c   :  { %286 = vmatpush3.bf16.msra.mxu0 %v309_v6 }
  0x3d   :  { %287 = vmatprep.subr.bf16.mxu0 %v399_v0 }
  0x40   :  { %288 = vmatpush3.bf16.msra.mxu0 %v310_v7 }
  0x41   :  { %289 = vmatprep.subr.bf16.mxu0 %v399_v0 }
  0x44   :  { %290 = vmatpush3.bf16.msra.mxu0 %v311_v8 }
  0x47   :  { %292 = vmatmul.mubr.bf16.vlgmr.msra.gmra.mrb[0].mxu0 %v312_v9 }
 0x11a   :  { %v154_v10 = vpop.f32.mrb[0].mxu0 }
 0x11b   :  { %v293_v11 = vpop.f32.mrb[1].mxu0  ;;  %v168_v13 = vmul.f32 %v154_v10, %v154_v10 }
 0x11c   :  { %v157_v12 = vpop.f32.mrb[2].mxu0 }
 0x11d   :  { %v161_v14 = vadd.f32 %v157_v12, %v154_v10  ;;  %v169_v15 = vmul.f32 %v157_v12, %v157_v12  ;;  %v294_v16 = vpop.f32.mrb[3].mxu0 }
 0x11f   :  { %v162_v17 = vrot.slane %v161_v14, 4  ;;  %v170_v18 = vadd.f32 %v169_v15, %v168_v13 }
 0x121   :  { %v163_v19 = vadd.f32 %v162_v17, %v161_v14  ;;  %v171_v20 = vrot.slane %v170_v18, 4 }
 0x123   :  { %v164_v21 = vrot.slane %v163_v19, 2  ;;  %v172_v22 = vadd.f32 %v171_v20, %v170_v18 }
 0x125   :  { %v165_v23 = vadd.f32 %v164_v21, %v163_v19  ;;  %v173_v24 = vrot.slane %v172_v22, 2 }
 0x127   :  { %v166_v25 = vrot.slane %v165_v23, 1  ;;  %v174_v26 = vadd.f32 %v173_v24, %v172_v22 }
 0x129   :  { %v167_v27 = vadd.f32 %v166_v25, %v165_v23  ;;  %v175_v28 = vrot.slane %v174_v26, 1 }
 0x12b   :  { %v176_v29 = vadd.f32 %v175_v28, %v174_v26  ;;  %v177_v30 = vmul.f32 0.125, %v167_v27 }
 0x12d   :  { %v178_v31 = vmul.f32 0.125, %v176_v29  ;;  %v179_v32 = vmul.f32 %v177_v30, %v177_v30 }
 0x12f   :  { %v180_v33 = vsub.f32 %v178_v31, %v179_v32 }
 0x131   :  { %v181_v34 = vmax.f32 %v180_v33, 0.0 }
 0x133   :  { %v182_v35 = vadd.f32 1e-05, %v181_v34 }
 0x135   :  { %313 = vrsqrt.f32 %v182_v35 }
 0x13f   :  { %v314_v40 = vpop.eup %313 }
 0x140   :  { %v188_v41 = vmul.f32 %v314_v40, %v187_v38 }
 0x142   :  { %v191_v43 = vmul.f32 %v188_v41, %v177_v30  ;;  %v196_v44 = vrot.slane %v188_v41, %v195_v39 }
 0x144   :  { %v192_v45 = vsub.f32 %v190_v42, %v191_v43  ;;  %v197_v46 = vmul.f32 %v196_v44, %v154_v10  ;;  %v198_v47 = vmul.f32 %v196_v44, %v157_v12 }
 0x146   :  { %v203_v48 = vrot.slane %v192_v45, %v195_v39 }
 0x148   :  { %v205_v49 = vadd.f32 %v203_v48, %v197_v46  ;;  %v206_v50 = vadd.f32 %v203_v48, %v198_v47 }
 0x14a   :  { %v260_v51 = vmul.f32 -1.442695, %v205_v49  ;;  %v261_v52 = vmul.f32 -1.442695, %v206_v50 }
 0x14c   :  { %315 = vpow2.f32 %v260_v51 }
 0x14d   :  { %317 = vpow2.f32 %v261_v52 }
 0x156   :  { %v316_v53 = vpop.eup %315 }
 0x157   :  { %v318_v54 = vpop.eup %317  ;;  %v213_v55 = vadd.f32 1.0, %v316_v53 }
 0x158   :  { %v214_v56 = vadd.f32 1.0, %v318_v54 }
 0x159   :  { %319 = vrcp.f32 %v213_v55 }
 0x15a   :  { %321 = vrcp.f32 %v214_v56 }
 0x163   :  { %v320_v60 = vpop.eup %319 }
 0x164   :  { %v322_v61 = vpop.eup %321  ;;  %v225_v62 = vmul.f32 %v320_v60, %v264_v58 }
 0x165   :  { %v226_v63 = vmul.f32 %v322_v61, %v265_v59 }
 0x166   :  { %227 = vst [vmem:[#allocation7] sm:$0xff] %v225_v62 }
 0x167   :  { %228 = vst [vmem:[#allocation7 + $0x8] sm:$0xff] %v226_v63 }
 0x168   :  { %378 = shalt.err (!%p375_p6)
}
 0x169   :  { %s379_s20 = scalar_lea.hbm %s475_s4, 256 }
 0x16a   :  { %p380_p7 = scmp.ne.s32.totalorder %s475_s4, %s379_s20  ;;  %p383_p8 = scmp.lt.u32.totalorder %s379_s20, %s475_s4 }
 0x16c   :  { %p385_p9 = pnand %p383_p8, %p380_p7 }
 0x16e   :  { %388 = shalt.err (!%p385_p9)
}
 0x16f   :  { %s402_s25 = smov 128   ;;  %s403_s26 = smov 8  }
 0x170   :  { %240 = dma.vmem_to_hbm [thread:$0]  %s235_s3, 256, %s475_s4, [#allocation4], %s402_s25, %s402_s25, %s403_s26  }
 0x171   :  { %393 = dma.done.wait [#allocation4], 256  }
 0x172   :  { %394 = vsyncadd [#allocation4], 4294967040 }
 0x173   :  { %244 = vsyncpa [#allocation3], 1 }
 0x174   :  { %245 = vsyncpa [#allocation6], 1 }
 0x175   :  { %246 = vsyncpa [#allocation4], 1 }

// kernel: tpu_custom_call.1
= control target key start
LH: loop header
LB: loop body
LE: loop exit
PB: predicated region body
PF: predicated region fallthrough
CT: control target
= control target key end

     0   :  { %9 = vsyncpa [#allocation3], 0  ;;  %s471_s0 = inlined_call_operand.hbm [shape: bf16[16,128], index: 0, kind: input, shape index: {}]   ;;  %s472_s1 = inlined_call_operand.hbm [shape: bf16[128,128], index: 1, kind: input, shape index: {}]   ;;  %s473_s2 = inlined_call_operand.vmem [shape: f32[1,128], index: 2, kind: input, shape index: {}]   ;;  %s474_s3 = inlined_call_operand.vmem [shape: f32[1,128], index: 3, kind: input, shape index: {}]   ;;  %s475_s4 = inlined_call_operand.hbm [shape: f32[16,128], index: 4, kind: output, shape index: {}]  }
   0x1   :  { %10 = vsyncpa [#allocation6], 0 }
   0x2   :  { %11 = vsyncpa [#allocation4], 0  ;;  %s395_s15 = smov [#allocation2]   ;;  %s323_s19 = scalar_lea.hbm %s471_s0, 128 }
   0x3   :  { %s17_s16 = sshll.u32 %s395_s15, 4  ;;  %p324_p0 = scmp.ne.s32.totalorder %s471_s0, %s323_s19  ;;  %s18_s16 = int_to_ptr.vmem [resolvable:$true] %s17_s16 }
   0x4   :  { %p327_p1 = scmp.lt.u32.totalorder %s323_s19, %s471_s0 }
   0x6   :  { %p329_p2 = pnand %p327_p1, %p324_p0 }
   0x8   :  { %332 = shalt.err (!%p329_p2)
}
   0x9   :  { %s333_s24 = scalar_lea.vmem %s18_s16, 128  ;;  %p338_p4 = scmp.lt.s32.totalorder %s18_s16, %s18_s16 }
   0xa   :  { %p334_p3 = scmp.ne.s32.totalorder %s18_s16, %s333_s24  ;;  %p339_p5 = scmp.lt.s32.totalorder %s333_s24, %s333_s24 }
   0xc   :  { %p340_p6 = por %p339_p5, %p338_p4 }
   0xe   :  { %p341_p7 = pnand %p340_p6, %p334_p3 }
  0x10   :  { %344 = shalt.err (!%p341_p7)
}
  0x11   :  { %s396_s25 = smov 64   ;;  %s397_s26 = smov 4  }
  0x12   :  { %23 = dma.hbm_to_vmem [thread:$0]  %s471_s0, 128, %s18_s16, [#allocation3], %s396_s25, %s396_s25, %s397_s26  }
  0x13   :  { %s398_s29 = smov [#allocation5]   ;;  %s345_s7 = scalar_lea.hbm %s472_s1, 1024 }
  0x14   :  { %s29_s30 = sshll.u32 %s398_s29, 4  ;;  %p346_p8 = scmp.ne.s32.totalorder %s472_s1, %s345_s7  ;;  %s30_s30 = int_to_ptr.vmem [resolvable:$true] %s29_s30 }
  0x15   :  { %p349_p9 = scmp.lt.u32.totalorder %s345_s7, %s472_s1 }
  0x17   :  { %p351_p10 = pnand %p349_p9, %p346_p8 }
  0x19   :  { %354 = shalt.err (!%p351_p10)
}
  0x1a   :  { %s355_s12 = scalar_lea.vmem %s30_s30, 1024  ;;  %p360_p12 = scmp.lt.s32.totalorder %s30_s30, %s30_s30 }
  0x1b   :  { %p356_p11 = scmp.ne.s32.totalorder %s30_s30, %s355_s12  ;;  %p361_p13 = scmp.lt.s32.totalorder %s355_s12, %s355_s12 }
  0x1d   :  { %p362_p0 = por %p361_p13, %p360_p12 }
  0x1f   :  { %p363_p1 = pnand %p362_p0, %p356_p11 }
  0x21   :  { %366 = shalt.err (!%p363_p1)
}
  0x22   :  { %35 = dma.hbm_to_vmem [thread:$0]  %s472_s1, 1024, %s30_s30, [#allocation6], %s396_s25, %s396_s25, %s397_s26  }
  0x23   :  { %389 = dma.done.wait [#allocation3], 128  }
  0x24   :  { %390 = vsyncadd [#allocation3], 4294967168 }
  0x25   :  { %391 = dma.done.wait [#allocation6], 1024  }
  0x26   :  { %392 = vsyncadd [#allocation6], 4294966272  ;;  %v399_v0 = vmov 0.0   ;;  %vm400_vm0 = vmmov 0   ;;  %v304_v1 = vld [vmem:[#allocation5] sm:$0xff]   ;;  %v305_v2 = vld [vmem:[#allocation5 + $0x8] sm:$0xff]   ;;  %v193_v36 = vlaneseq }
  0x27   :  { %275 = vmatprep.subr.bf16.mxu0 %v399_v0  ;;  %291 = vmatprep.mubr.msk.bf16.mxu0 %vm400_vm0, %v399_v0  ;;  %v306_v3 = vld [vmem:[#allocation5 + $0x10] sm:$0xff]   ;;  %v307_v4 = vld [vmem:[#allocation5 + $0x18] sm:$0xff]   ;;  %v308_v5 = vld [vmem:[#allocation5 + $0x20] sm:$0xff]  }
  0x28   :  { %276 = vmatpush3.bf16.msra.mxu0 %v304_v1  ;;  %v309_v6 = vld [vmem:[#allocation5 + $0x28] sm:$0xff]   ;;  %v310_v7 = vld [vmem:[#allocation5 + $0x30] sm:$0xff]   ;;  %v311_v8 = vld [vmem:[#allocation5 + $0x38] sm:$0xff]   ;;  %v194_v37 = vshrl.u32 %v193_v36, 7 }
  0x29   :  { %277 = vmatprep.subr.bf16.mxu0 %v399_v0  ;;  %v312_v9 = vld [vmem:[#allocation2] sm:$0xff]  }
  0x2a   :  { %v187_v38 = vld [vmem:[%s473_s2] sm:$0x1]  ;;  %v195_v39 = vsub.s32 0, %v194_v37  ;;  %s401_s2 = smov [#allocation7]  }
  0x2b   :  { %v190_v42 = vld [vmem:[%s474_s3] sm:$0x1]  ;;  %s234_s3 = sshll.u32 %s401_s2, 4  ;;  %s235_s3 = int_to_ptr.vmem [resolvable:$true] %s234_s3 }
  0x2c   :  { %278 = vmatpush3.bf16.msra.mxu0 %v305_v2  ;;  %v263_v57 = vld [vmem:[#allocation2] sm:$0xff]   ;;  %s367_s17 = scalar_lea.vmem %s235_s3, 256  ;;  %p372_p3 = scmp.lt.s32.totalorder %s235_s3, %s235_s3 }
  0x2d   :  { %279 = vmatprep.subr.bf16.mxu0 %v399_v0  ;;  %v264_v58 = vunpack.c.l.bf16 %v263_v57  ;;  %v265_v59 = vunpack.c.h.bf16 %v263_v57  ;;  %p368_p2 = scmp.ne.s32.totalorder %s235_s3, %s367_s17  ;;  %p373_p4 = scmp.lt.s32.totalorder %s367_s17, %s367_s17 }
  0x2f   :  { %p374_p5 = por %p373_p4, %p372_p3 }
  0x30   :  { %280 = vmatpush3.bf16.msra.mxu0 %v306_v3 }
  0x31   :  { %281 = vmatprep.subr.bf16.mxu0 %v399_v0  ;;  %p375_p6 = pnand %p374_p5, %p368_p2 }
  0x34   :  { %282 = vmatpush3.bf16.msra.mxu0 %v307_v4 }
  0x35   :  { %283 = vmatprep.subr.bf16.mxu0 %v399_v0 }
  0x38   :  { %284 = vmatpush3.bf16.msra.mxu0 %v308_v5 }
  0x39   :  { %285 = vmatprep.subr.bf16.mxu0 %v399_v0 }
  0x3c   :  { %286 = vmatpush3.bf16.msra.mxu0 %v309_v6 }
  0x3d   :  { %287 = vmatprep.subr.bf16.mxu0 %v399_v0 }
  0x40   :  { %288 = vmatpush3.bf16.msra.mxu0 %v310_v7 }
  0x41   :  { %289 = vmatprep.subr.bf16.mxu0 %v399_v0 }
  0x44   :  { %290 = vmatpush3.bf16.msra.mxu0 %v311_v8 }
  0x47   :  { %292 = vmatmul.mubr.bf16.vlgmr.msra.gmra.mrb[0].mxu0 %v312_v9 }
 0x11a   :  { %v154_v10 = vpop.f32.mrb[0].mxu0 }
 0x11b   :  { %v293_v11 = vpop.f32.mrb[1].mxu0  ;;  %v168_v13 = vmul.f32 %v154_v10, %v154_v10 }
 0x11c   :  { %v157_v12 = vpop.f32.mrb[2].mxu0 }
 0x11d   :  { %v161_v14 = vadd.f32 %v157_v12, %v154_v10  ;;  %v169_v15 = vmul.f32 %v157_v12, %v157_v12  ;;  %v294_v16 = vpop.f32.mrb[3].mxu0 }
 0x11f   :  { %v162_v17 = vrot.slane %v161_v14, 4  ;;  %v170_v18 = vadd.f32 %v169_v15, %v168_v13 }
 0x121   :  { %v163_v19 = vadd.f32 %v162_v17, %v161_v14  ;;  %v171_v20 = vrot.slane %v170_v18, 4 }
 0x123   :  { %v164_v21 = vrot.slane %v163_v19, 2  ;;  %v172_v22 = vadd.f32 %v171_v20, %v170_v18 }
 0x125   :  { %v165_v23 = vadd.f32 %v164_v21, %v163_v19  ;;  %v173_v24 = vrot.slane %v172_v22, 2 }
 0x127   :  { %v166_v25 = vrot.slane %v165_v23, 1  ;;  %v174_v26 = vadd.f32 %v173_v24, %v172_v22 }
 0x129   :  { %v167_v27 = vadd.f32 %v166_v25, %v165_v23  ;;  %v175_v28 = vrot.slane %v174_v26, 1 }
 0x12b   :  { %v176_v29 = vadd.f32 %v175_v28, %v174_v26  ;;  %v177_v30 = vmul.f32 0.125, %v167_v27 }
 0x12d   :  { %v178_v31 = vmul.f32 0.125, %v176_v29  ;;  %v179_v32 = vmul.f32 %v177_v30, %v177_v30 }
 0x12f   :  { %v180_v33 = vsub.f32 %v178_v31, %v179_v32 }
 0x131   :  { %v181_v34 = vmax.f32 %v180_v33, 0.0 }
 0x133   :  { %v182_v35 = vadd.f32 1e-05, %v181_v34 }
 0x135   :  { %313 = vrsqrt.f32 %v182_v35 }
 0x13f   :  { %v314_v40 = vpop.eup %313 }
 0x140   :  { %v188_v41 = vmul.f32 %v314_v40, %v187_v38 }
 0x142   :  { %v191_v43 = vmul.f32 %v188_v41, %v177_v30  ;;  %v196_v44 = vrot.slane %v188_v41, %v195_v39 }
 0x144   :  { %v192_v45 = vsub.f32 %v190_v42, %v191_v43  ;;  %v197_v46 = vmul.f32 %v196_v44, %v154_v10  ;;  %v198_v47 = vmul.f32 %v196_v44, %v157_v12 }
 0x146   :  { %v203_v48 = vrot.slane %v192_v45, %v195_v39 }
 0x148   :  { %v205_v49 = vadd.f32 %v203_v48, %v197_v46  ;;  %v206_v50 = vadd.f32 %v203_v48, %v198_v47 }
 0x14a   :  { %v260_v51 = vmul.f32 -1.442695, %v205_v49  ;;  %v261_v52 = vmul.f32 -1.442695, %v206_v50 }
 0x14c   :  { %315 = vpow2.f32 %v260_v51 }
 0x14d   :  { %317 = vpow2.f32 %v261_v52 }
 0x156   :  { %v316_v53 = vpop.eup %315 }
 0x157   :  { %v318_v54 = vpop.eup %317  ;;  %v213_v55 = vadd.f32 1.0, %v316_v53 }
 0x158   :  { %v214_v56 = vadd.f32 1.0, %v318_v54 }
 0x159   :  { %319 = vrcp.f32 %v213_v55 }
 0x15a   :  { %321 = vrcp.f32 %v214_v56 }
 0x163   :  { %v320_v60 = vpop.eup %319 }
 0x164   :  { %v322_v61 = vpop.eup %321  ;;  %v225_v62 = vmul.f32 %v320_v60, %v264_v58 }
 0x165   :  { %v226_v63 = vmul.f32 %v322_v61, %v265_v59 }
 0x166   :  { %227 = vst [vmem:[#allocation7] sm:$0xff] %v225_v62 }
 0x167   :  { %228 = vst [vmem:[#allocation7 + $0x8] sm:$0xff] %v226_v63 }
 0x168   :  { %378 = shalt.err (!%p375_p6)
}
 0x169   :  { %s379_s20 = scalar_lea.hbm %s475_s4, 256 }
 0x16a   :  { %p380_p7 = scmp.ne.s32.totalorder %s475_s4, %s379_s20  ;;  %p383_p8 = scmp.lt.u32.totalorder %s379_s20, %s475_s4 }
 0x16c   :  { %p385_p9 = pnand %p383_p8, %p380_p7 }
 0x16e   :  { %388 = shalt.err (!%p385_p9)
}
 0x16f   :  { %s402_s25 = smov 128   ;;  %s403_s26 = smov 8  }
 0x170   :  { %240 = dma.vmem_to_hbm [thread:$0]  %s235_s3, 256, %s475_s4, [#allocation4], %s402_s25, %s402_s25, %s403_s26  }
 0x171   :  { %393 = dma.done.wait [#allocation4], 256  }
 0x172   :  { %394 = vsyncadd [#allocation4], 4294967040 }
 0x173   :  { %244 = vsyncpa [#allocation3], 1 }
 0x174   :  { %245 = vsyncpa [#allocation6], 1 }
 0x175   :  { %246 = vsyncpa [#allocation4], 1 }

</bundles_post_ra>
